<compile_context>
chip_gen: v7x
topology: tpu7x:2x2x1
jax: 0.10.0
libtpu: 0.0.40
codegen_flags: <defaults>
</compile_context>

<pallas_src>
import jax
import jax.numpy as jnp
from jax.experimental import pallas as pl
from jax.experimental.pallas import tpu as pltpu


# ---------------------------------------------------------------------------
# Kernel: elementwise y = x * w + b on a lane-dense (tile_r, LANES) VMEM tile.
# ---------------------------------------------------------------------------
def _linear1x1_kernel(w_ref, b_ref, x_ref, o_ref):
    # w_ref, b_ref: (1, 1) f32 SMEM scalars; x_ref/o_ref: (tile_r, LANES) VMEM.
    w = w_ref[0, 0]
    b = b_ref[0, 0]
    o_ref[...] = (x_ref[...] * w + b).astype(o_ref.dtype)


# ---------------------------------------------------------------------------
# Wrapper.
# ---------------------------------------------------------------------------
_LANES = 512              # lane width (multiple of 128) -> unmasked vst
_MAX_TILE_R = 1024        # (1024, 512) f32 = 2 MiB per buffer
_PALLAS_MIN_ELEMS = 131072  # below this, plain XLA wins (launch overhead)


def _round_up(x, m):
    return ((x + m - 1) // m) * m


def _pallas_linear1x1(x_flat, weight, bias, n, out_dtype):
    """Lane-dense, tiled, auto-pipelined y = x*w + b on a flat (n,) stream."""
    rows = pl.cdiv(n, _LANES)                       # rows actually needed
    # Tile rows: big (up to 2 MiB/buffer) but split so grid >= 2 when possible
    # (lets v7x's two TensorCores share the work via "parallel" semantics).
    tile_r = min(_MAX_TILE_R, max(8, _round_up(pl.cdiv(rows, 2), 8)))
    grid = (pl.cdiv(rows, tile_r),)                 # ragged last block is masked

    padded = rows * _LANES
    flat = x_flat
    if padded != n:                                 # only pad when unaligned
        flat = jnp.pad(flat, (0, padded - n))
    x2d = flat.reshape(rows, _LANES)

    # Parameters stay f32 on the scalar (SMEM) path.
    w2d = weight.reshape(1, 1).astype(jnp.float32)
    b2d = bias.reshape(1, 1).astype(jnp.float32)

    out2d = pl.pallas_call(
        _linear1x1_kernel,
        out_shape=jax.ShapeDtypeStruct((rows, _LANES), out_dtype),
        grid_spec=pltpu.PrefetchScalarGridSpec(
            num_scalar_prefetch=0,
            grid=grid,
            in_specs=[
                # weight / bias: whole (1,1) arrays in SMEM (scalar path,
                # no pointless per-step VMEM double-buffering).
                pl.BlockSpec(memory_space=pltpu.MemorySpace.SMEM),
                pl.BlockSpec(memory_space=pltpu.MemorySpace.SMEM),
                # x: lane-dense tiles, auto-pipelined over the batch axis;
                # default Buffered(2) is enough for a BW-bound stream.
                pl.BlockSpec((tile_r, _LANES), lambda i: (i, 0)),
            ],
            out_specs=pl.BlockSpec((tile_r, _LANES), lambda i: (i, 0)),
        ),
        compiler_params=pltpu.CompilerParams(
            # Batch tiles are independent -> allow megacore sharding on v7x.
            dimension_semantics=("parallel",),
        ),
    )(w2d, b2d, x2d)

    out_flat = out2d.reshape(-1)
    if padded != n:                                 # only slice when we padded
        out_flat = out_flat[:n]
    return out_flat


def simple_network_forward(x, weight, bias, *, force_pallas=False):
    """Pallas equivalent of SimpleNetWork.forward (nn.Linear(1, 1)).

    x:      (N, 1) float32
    weight: (1, 1) float32  (PyTorch Linear weight, out_features x in_features)
    bias:   (1,)   float32
    returns (N, 1) float32
    """
    n, in_f = x.shape
    assert in_f == 1, "SimpleNetWork has in_features == 1"

    # Small-N fast path: one fused XLA kernel beats a pallas_call launch plus
    # any re-layout for tiny inputs.
    if n < _PALLAS_MIN_ELEMS and not force_pallas:
        w = weight.reshape(()).astype(jnp.float32)
        b = bias.reshape(()).astype(jnp.float32)
        return (x.astype(jnp.float32) * w + b).astype(x.dtype)

    out_flat = _pallas_linear1x1(x.reshape(-1), weight, bias, n, x.dtype)
    return out_flat.reshape(n, 1)


if __name__ == "__main__":
    key = jax.random.PRNGKey(0)
    kx, kw, kb, kx2 = jax.random.split(key, 4)

    # Deterministic parameter init mimicking nn.Linear(1, 1) defaults:
    # uniform in [-1/sqrt(fan_in), 1/sqrt(fan_in)] = [-1, 1].
    weight = jax.random.uniform(kw, (1, 1), dtype=jnp.float32, minval=-1.0, maxval=1.0)
    bias = jax.random.uniform(kb, (1,), dtype=jnp.float32, minval=-1.0, maxval=1.0)

    # --- case 1: module-sized input (batch=8, in_features=1), Pallas path ---
    x_small = jax.random.normal(kx, (8, 1), dtype=jnp.float32)
    y_small = simple_network_forward(x_small, weight, bias, force_pallas=True)
    jax.block_until_ready(y_small)
    ref_small = x_small @ weight.T + bias
    assert y_small.shape == ref_small.shape, "shape mismatch (small)"
    assert jnp.allclose(y_small, ref_small, atol=1e-6), "mismatch (small, pallas)"

    # --- case 2: unaligned multi-tile input (ragged last block + pad path) ---
    x_rag = jax.random.normal(kx2, (12345, 1), dtype=jnp.float32)
    y_rag = simple_network_forward(x_rag, weight, bias, force_pallas=True)
    jax.block_until_ready(y_rag)
    ref_rag = x_rag @ weight.T + bias
    assert y_rag.shape == ref_rag.shape, "shape mismatch (ragged)"
    assert jnp.allclose(y_rag, ref_rag, atol=1e-6), "mismatch (ragged, pallas)"

    # --- case 3: small-N XLA fast path (default behavior for tiny inputs) ---
    y_fast = simple_network_forward(x_small, weight, bias)
    jax.block_until_ready(y_fast)
    assert jnp.allclose(y_fast, ref_small, atol=1e-6), "mismatch (fast path)"

    print("KERNEL_OK")
</pallas_src>

<mosaic_0001>
module attributes {stable_mosaic.version = 11 : i64} {
  func.func @_linear1x1_kernel(%arg0: i32, %arg1: memref<1x1xf32, #tpu.memory_space<smem>>, %arg2: memref<1x1xf32, #tpu.memory_space<smem>>, %arg3: memref<8x512xf32, #tpu.memory_space<vmem>>, %arg4: memref<8x512xf32, #tpu.memory_space<vmem>>) attributes {dimension_semantics = [#tpu.dimension_semantics<parallel>], iteration_bounds = array<i64: 1>, scalar_prefetch = 0 : i64, scratch_operands = 0 : i64, tpu.core_type = #tpu.core_type<tc>, window_params = [{transform_indices = @transform_0, window_bounds = array<i64: 1, 1>}, {transform_indices = @transform_1, window_bounds = array<i64: 1, 1>}, {transform_indices = @transform_2, window_bounds = array<i64: 8, 512>}, {transform_indices = @transform_3, window_bounds = array<i64: 8, 512>}]} {
    %c0 = arith.constant 0 : index
    %c0_0 = arith.constant 0 : index
    %0 = memref.load %arg1[%c0, %c0_0] : memref<1x1xf32, #tpu.memory_space<smem>>
    %c0_1 = arith.constant 0 : index
    %c0_2 = arith.constant 0 : index
    %1 = memref.load %arg2[%c0_1, %c0_2] : memref<1x1xf32, #tpu.memory_space<smem>>
    %c0_3 = arith.constant 0 : index
    %c0_4 = arith.constant 0 : index
    %2 = vector.load %arg3[%c0_3, %c0_4] : memref<8x512xf32, #tpu.memory_space<vmem>>, vector<8x512xf32>
    %3 = vector.broadcast %0 : f32 to vector<8x512xf32>
    %4 = arith.mulf %2, %3 : vector<8x512xf32>
    %5 = vector.broadcast %1 : f32 to vector<8x512xf32>
    %6 = arith.addf %4, %5 : vector<8x512xf32>
    %c0_5 = arith.constant 0 : index
    %c0_6 = arith.constant 0 : index
    %7 = vector.load %arg4[%c0_5, %c0_6] : memref<8x512xf32, #tpu.memory_space<vmem>>, vector<8x512xf32>
    tpu.vector_store %arg4[%c0_5, %c0_6], %6 {strides = array<i32>} : memref<8x512xf32, #tpu.memory_space<vmem>>, vector<8x512xf32>,
    return
  }
  func.func @transform_0(%arg0: i32) -> (i32, i32) {
    %c0_i32 = arith.constant 0 : i32
    %c0_i32_0 = arith.constant 0 : i32
    %c0_i32_1 = arith.constant 0 : i32
    return %c0_i32, %c0_i32_0 : i32, i32
  }
  func.func @transform_1(%arg0: i32) -> (i32, i32) {
    %c0_i32 = arith.constant 0 : i32
    %c0_i32_0 = arith.constant 0 : i32
    %c0_i32_1 = arith.constant 0 : i32
    return %c0_i32, %c0_i32_0 : i32, i32
  }
  func.func @transform_2(%arg0: i32) -> (i32, i32) {
    %c0_i32 = arith.constant 0 : i32
    %c0_i32_0 = arith.constant 0 : i32
    return %arg0, %c0_i32 : i32, i32
  }
  func.func @transform_3(%arg0: i32) -> (i32, i32) {
    %c0_i32 = arith.constant 0 : i32
    %c0_i32_0 = arith.constant 0 : i32
    return %arg0, %c0_i32 : i32, i32
  }
}

</mosaic_0001>

<bundles_post_ra>
// kernel: tpu_custom_call.1
= control target key start
LH: loop header
LB: loop body
LE: loop exit
PB: predicated region body
PF: predicated region fallthrough
CT: control target
= control target key end

     0   :  { %10 = vsyncpa [#allocation5], 0  ;;  %v45_v3 = vlaneseq  ;;  %s185_s0 = inlined_call_operand.<no memory space> [shape: f32[1,1], index: 0, kind: input, shape index: {}]   ;;  %s186_s1 = inlined_call_operand.<no memory space> [shape: f32[1,1], index: 1, kind: input, shape index: {}]   ;;  %s187_s2 = inlined_call_operand.vmem [shape: f32[1,512], index: 2, kind: input, shape index: {}]   ;;  %s188_s3 = inlined_call_operand.hbm [shape: f32[1,512], index: 3, kind: output, shape index: {}]  }
   0x1   :  { %v19_v0 = vld [vmem:[%s187_s2] sm:$0xf]  ;;  %v27_v1 = vstv %s185_s0  ;;  %v36_v2 = vstv %s186_s1  ;;  %v20_v5 = vld [vmem:[%s187_s2 + $0x4] sm:$0xf] }
   0x2   :  { %v28_v4 = vmul.f32 %v27_v1, %v19_v0  ;;  %v21_v6 = vld [vmem:[%s187_s2 + $0x8] sm:$0xf]  ;;  %v22_v7 = vld [vmem:[%s187_s2 + $0xc] sm:$0xf]  ;;  %vm141_vm0 = vcmp.lt.s32.totalorder %v45_v3, 512  ;;  %v29_v9 = vmul.f32 %v27_v1, %v20_v5 }
   0x3   :  { %v30_v10 = vmul.f32 %v27_v1, %v21_v6  ;;  %v31_v11 = vmul.f32 %v27_v1, %v22_v7  ;;  %v23_v12 = vld [vmem:[%s187_s2 + $0x10] sm:$0xf]  ;;  %v24_v13 = vld [vmem:[%s187_s2 + $0x14] sm:$0xf]  ;;  %v25_v17 = vld [vmem:[%s187_s2 + $0x18] sm:$0xf] }
   0x4   :  { %v37_v14 = vadd.f32 %v36_v2, %v28_v4  ;;  %v32_v15 = vmul.f32 %v27_v1, %v23_v12  ;;  %v33_v16 = vmul.f32 %v27_v1, %v24_v13  ;;  %v26_v18 = vld [vmem:[%s187_s2 + $0x1c] sm:$0xf]  ;;  %v38_v19 = vadd.f32 %v36_v2, %v29_v9 }
   0x5   :  { %v39_v20 = vadd.f32 %v36_v2, %v30_v10  ;;  %v40_v21 = vadd.f32 %v36_v2, %v31_v11  ;;  %v34_v22 = vmul.f32 %v27_v1, %v25_v17  ;;  %v35_v25 = vmul.f32 %v27_v1, %v26_v18 }
   0x6   :  { %49 = vst.msk [vmem:[#allocation4] sm:$0xf] %vm141_vm0, %v37_v14  ;;  %v41_v23 = vadd.f32 %v36_v2, %v32_v15  ;;  %v42_v24 = vadd.f32 %v36_v2, %v33_v16  ;;  %50 = vst.msk [vmem:[#allocation4 + $0x4] sm:$0xf] %vm141_vm0, %v38_v19 }
   0x7   :  { %51 = vst.msk [vmem:[#allocation4 + $0x8] sm:$0xf] %vm141_vm0, %v39_v20  ;;  %52 = vst.msk [vmem:[#allocation4 + $0xc] sm:$0xf] %vm141_vm0, %v40_v21  ;;  %v43_v26 = vadd.f32 %v36_v2, %v34_v22  ;;  %v44_v27 = vadd.f32 %v36_v2, %v35_v25 }
   0x8   :  { %53 = vst.msk [vmem:[#allocation4 + $0x10] sm:$0xf] %vm141_vm0, %v41_v23  ;;  %54 = vst.msk [vmem:[#allocation4 + $0x14] sm:$0xf] %vm141_vm0, %v42_v24 }
   0x9   :  { %55 = vst.msk [vmem:[#allocation4 + $0x18] sm:$0xf] %vm141_vm0, %v43_v26  ;;  %56 = vst.msk [vmem:[#allocation4 + $0x1c] sm:$0xf] %vm141_vm0, %v44_v27 }
   0xa   :  { %61 = vsyncadd [#allocation5], 448  ;;  %s100_s2 = smov [#allocation4]  }
   0xb   :  { %s62_s30 = sshll.u32 %s100_s2, 4  ;;  %s63_s30 = int_to_ptr.vmem [resolvable:$true] %s62_s30 }
   0xc   :  { %s76_s4 = scalar_lea.vmem %s63_s30, 64  ;;  %s80_s5 = scalar_lea.vmem %s63_s30, 512 }
   0xd   :  { %p77_p0 = scmp.ne.s32.totalorder %s63_s30, %s76_s4  ;;  %p81_p1 = scmp.lt.s32.totalorder %s63_s30, %s63_s30 }
   0xe   :  { %p82_p2 = scmp.lt.s32.totalorder %s80_s5, %s76_s4 }
  0x10   :  { %p83_p3 = por %p82_p2, %p81_p1 }
  0x12   :  { %p84_p4 = pnand %p83_p3, %p77_p0 }
  0x14   :  { %87 = shalt.err (!%p84_p4)
}
  0x15   :  { %s88_s8 = scalar_lea.hbm %s188_s3, 64 }
  0x16   :  { %p89_p5 = scmp.ne.s32.totalorder %s188_s3, %s88_s8  ;;  %p92_p6 = scmp.lt.u32.totalorder %s88_s8, %s188_s3 }
  0x18   :  { %p94_p7 = pnand %p92_p6, %p89_p5 }
  0x1a   :  { %97 = shalt.err (!%p94_p7)
}
  0x1b   :  { %s101_s13 = smov 64   ;;  %s102_s14 = smov 4  }
  0x1c   :  { %68 = dma.vmem_to_hbm [thread:$0]  %s63_s30, 64, %s188_s3, [#allocation5], %s101_s13, %s101_s13, %s102_s14  }
  0x1d   :  { %98 = dma.done.wait [#allocation5], 512  }
  0x1e   :  { %99 = vsyncadd [#allocation5], 4294966784 }
  0x1f   :  { %72 = vsyncpa [#allocation5], 1 }

</bundles_post_ra>
